<compile_context>
chip_gen: v5e
topology: v5e:2x2
jax: 0.10.0
libtpu: 0.0.40
codegen_flags: <defaults>
</compile_context>

<pallas_src>
import jax
import jax.numpy as jnp
from jax.experimental import pallas as pl
from jax.experimental.pallas import tpu as pltpu

# Original layer dims / activations of the PyTorch module.
DIMS = [28 * 28, 128, 64, 12, 3, 12, 64, 128, 28 * 28]
ACTS = ["relu", "relu", "relu", "none", "relu", "relu", "relu", "sigmoid"]

LANE = 128
TB_MAX = 512  # batch-tile cap; fits comfortably in VMEM on v5e/v6e/v7x


def _round_up(n, m):
    return ((n + m - 1) // m) * m


def _autoencoder_kernel(x_ref, *refs):
    """refs = (w1, b1, ..., w7, b7, out_ref). Weights bf16, biases f32, out bf16."""
    out_ref = refs[-1]
    param_refs = refs[:-1]
    n_layers = len(param_refs) // 2

    h = x_ref[...].astype(jnp.bfloat16)           # (TB, 784) f32 -> bf16 (cheap VPU cast)
    for i in range(n_layers):
        w = param_refs[2 * i][...]                # bf16 (in, out)
        b = param_refs[2 * i + 1][...]            # f32  (1, out)
        z = jnp.dot(h, w, preferred_element_type=jnp.float32) + b
        if i < n_layers - 1:
            h = jnp.maximum(z, 0.0).astype(jnp.bfloat16)
        else:
            # sigmoid(z) == 0.5 * (tanh(z/2) + 1): one EUP op, f32 on all gens.
            out_ref[...] = (0.5 * (jnp.tanh(0.5 * z) + 1.0)).astype(out_ref.dtype)


def _prepare_params(params):
    """Fuse 12->3->12 bottleneck (exact), zero-pad hidden widths to 128 lanes
    (exact), cast weights to bf16 (biases stay f32 for the f32 accumulator)."""
    pairs = [(params[2 * i], params[2 * i + 1]) for i in range(len(DIMS) - 1)]

    # Fuse layer 3 (12->3, no activation) with layer 4 (3->12): exact in f32.
    w4, b4 = pairs[3]
    w5, b5 = pairs[4]
    w45 = w4 @ w5                 # (12, 12)
    b45 = b4 @ w5 + b5            # (1, 12)
    fused = pairs[:3] + [(w45, b45)] + pairs[5:]   # 7 layers

    out = []
    n = len(fused)
    for i, (w, b) in enumerate(fused):
        in_d, out_d = w.shape
        in_pad = in_d if i == 0 else _round_up(in_d, LANE)        # keep 784 input rows
        out_pad = out_d if i == n - 1 else _round_up(out_d, LANE)  # keep 784 output cols
        w = jnp.pad(w, ((0, in_pad - in_d), (0, out_pad - out_d)))
        b = jnp.pad(b, ((0, 0), (0, out_pad - out_d)))
        out.append(w.astype(jnp.bfloat16))   # bf16 weights: single-pass MXU
        out.append(b.astype(jnp.float32))    # f32 bias, added to f32 accumulator
    return out


def _pick_tb(batch):
    """Batch tile: single full-dim tile for small B; >= 2 tiles (multiple of 8
    rows) when B > 128 so v7x's two TensorCores both get work; capped at 512."""
    if batch <= 128:
        return batch                      # block dim == full array dim: always legal
    return min(TB_MAX, _round_up(pl.cdiv(batch, 2), 8))


@jax.jit
def linear_autoencoder(x, params):
    """x: (B, 784) float32. params: flat list [w1, b1, ..., w8, b8] (f32).
    Returns (B, 784) bfloat16 (post-sigmoid values in [0, 1])."""
    B, d_in = x.shape
    assert d_in == DIMS[0]

    prepped = _prepare_params(params)     # tiny ops; fusion/padding exact pre-bf16

    TB = _pick_tb(B)
    grid = (pl.cdiv(B, TB),)              # ragged last tile masked by Pallas

    in_specs = ([pl.BlockSpec((TB, d_in), lambda i: (i, 0))]            # f32 x, no pre-pad
                + [pl.BlockSpec(p.shape, lambda i: (0, 0)) for p in prepped])  # VMEM-resident
    out_spec = pl.BlockSpec((TB, DIMS[-1]), lambda i: (i, 0))           # bf16, full 784 cols

    n_layers = len(prepped) // 2
    flops = 2 * B * sum(prepped[2 * i].shape[0] * prepped[2 * i].shape[1]
                        for i in range(n_layers))
    bytes_accessed = (B * d_in * 4                       # f32 input stream
                      + B * DIMS[-1] * 2                 # bf16 output stream
                      + sum(p.size * p.dtype.itemsize for p in prepped))
    cost = pl.CostEstimate(flops=flops,
                           transcendentals=B * DIMS[-1],  # one tanh per output element
                           bytes_accessed=bytes_accessed)

    return pl.pallas_call(
        _autoencoder_kernel,
        out_shape=jax.ShapeDtypeStruct((B, DIMS[-1]), jnp.bfloat16),
        grid_spec=pltpu.PrefetchScalarGridSpec(
            num_scalar_prefetch=0,
            grid=grid,
            in_specs=in_specs,
            out_specs=out_spec,
        ),
        compiler_params=pltpu.CompilerParams(
            dimension_semantics=("parallel",),   # independent batch tiles -> megacore on v7x
        ),
        cost_estimate=cost,
    )(x, *prepped)


def init_params(key):
    """Deterministic init mimicking PyTorch nn.Linear default U[-1/sqrt(in), 1/sqrt(in)]."""
    params = []
    for i in range(len(DIMS) - 1):
        fan_in, fan_out = DIMS[i], DIMS[i + 1]
        key, kw, kb = jax.random.split(key, 3)
        bound = 1.0 / (fan_in ** 0.5)
        w = jax.random.uniform(kw, (fan_in, fan_out), jnp.float32, -bound, bound)
        b = jax.random.uniform(kb, (1, fan_out), jnp.float32, -bound, bound)
        params += [w, b]
    return params


def reference_forward(x, params):
    """Pure-JAX f32 reference of the original (unfused, unpadded) network."""
    h = x
    for i in range(len(DIMS) - 1):
        w, b = params[2 * i], params[2 * i + 1]
        h = h @ w + b
        if ACTS[i] == "relu":
            h = jnp.maximum(h, 0.0)
        elif ACTS[i] == "sigmoid":
            h = jax.nn.sigmoid(h)
    return h


if __name__ == "__main__":
    key = jax.random.PRNGKey(0)
    k_params, k_x = jax.random.split(key)

    params = init_params(k_params)
    B = 8  # small batch for the self-test
    x = jax.random.uniform(k_x, (B, 28 * 28), jnp.float32)

    out = jax.block_until_ready(linear_autoencoder(x, params))
    ref = reference_forward(x, params)

    assert out.shape == (B, 28 * 28)
    out_f32 = out.astype(jnp.float32)
    max_err = float(jnp.max(jnp.abs(out_f32 - ref)))
    # bf16 matmul inputs + bf16 output store -> loosened tolerance vs f32 reference.
    assert jnp.allclose(out_f32, ref, atol=3e-2, rtol=3e-2), (
        f"mismatch vs JAX reference, max abs err = {max_err}")

    print("KERNEL_OK")
</pallas_src>

<mosaic_0001>
module attributes {stable_mosaic.version = 11 : i64} {
  func.func @_autoencoder_kernel(%arg0: i32, %arg1: memref<8x784xf32, #tpu.memory_space<vmem>>, %arg2: memref<784x128xbf16, #tpu.memory_space<vmem>>, %arg3: memref<1x128xf32, #tpu.memory_space<vmem>>, %arg4: memref<128x128xbf16, #tpu.memory_space<vmem>>, %arg5: memref<1x128xf32, #tpu.memory_space<vmem>>, %arg6: memref<128x128xbf16, #tpu.memory_space<vmem>>, %arg7: memref<1x128xf32, #tpu.memory_space<vmem>>, %arg8: memref<128x128xbf16, #tpu.memory_space<vmem>>, %arg9: memref<1x128xf32, #tpu.memory_space<vmem>>, %arg10: memref<128x128xbf16, #tpu.memory_space<vmem>>, %arg11: memref<1x128xf32, #tpu.memory_space<vmem>>, %arg12: memref<128x128xbf16, #tpu.memory_space<vmem>>, %arg13: memref<1x128xf32, #tpu.memory_space<vmem>>, %arg14: memref<128x784xbf16, #tpu.memory_space<vmem>>, %arg15: memref<1x784xf32, #tpu.memory_space<vmem>>, %arg16: memref<8x784xbf16, #tpu.memory_space<vmem>>) attributes {dimension_semantics = [#tpu.dimension_semantics<parallel>], iteration_bounds = array<i64: 1>, scalar_prefetch = 0 : i64, scratch_operands = 0 : i64, tpu.core_type = #tpu.core_type<tc>, window_params = [{transform_indices = @transform_0, window_bounds = array<i64: 8, 784>}, {pipeline_mode = #tpu.pipeline_mode<synchronous>, transform_indices = @transform_1, window_bounds = array<i64: 784, 128>}, {pipeline_mode = #tpu.pipeline_mode<synchronous>, transform_indices = @transform_2, window_bounds = array<i64: 1, 128>}, {pipeline_mode = #tpu.pipeline_mode<synchronous>, transform_indices = @transform_3, window_bounds = array<i64: 128, 128>}, {pipeline_mode = #tpu.pipeline_mode<synchronous>, transform_indices = @transform_4, window_bounds = array<i64: 1, 128>}, {pipeline_mode = #tpu.pipeline_mode<synchronous>, transform_indices = @transform_5, window_bounds = array<i64: 128, 128>}, {pipeline_mode = #tpu.pipeline_mode<synchronous>, transform_indices = @transform_6, window_bounds = array<i64: 1, 128>}, {pipeline_mode = #tpu.pipeline_mode<synchronous>, transform_indices = @transform_7, window_bounds = array<i64: 128, 128>}, {pipeline_mode = #tpu.pipeline_mode<synchronous>, transform_indices = @transform_8, window_bounds = array<i64: 1, 128>}, {pipeline_mode = #tpu.pipeline_mode<synchronous>, transform_indices = @transform_9, window_bounds = array<i64: 128, 128>}, {pipeline_mode = #tpu.pipeline_mode<synchronous>, transform_indices = @transform_10, window_bounds = array<i64: 1, 128>}, {pipeline_mode = #tpu.pipeline_mode<synchronous>, transform_indices = @transform_11, window_bounds = array<i64: 128, 128>}, {pipeline_mode = #tpu.pipeline_mode<synchronous>, transform_indices = @transform_12, window_bounds = array<i64: 1, 128>}, {pipeline_mode = #tpu.pipeline_mode<synchronous>, transform_indices = @transform_13, window_bounds = array<i64: 128, 784>}, {pipeline_mode = #tpu.pipeline_mode<synchronous>, transform_indices = @transform_14, window_bounds = array<i64: 1, 784>}, {transform_indices = @transform_15, window_bounds = array<i64: 8, 784>}]} {
    %c0 = arith.constant 0 : index
    %c0_0 = arith.constant 0 : index
    %0 = vector.load %arg1[%c0, %c0_0] : memref<8x784xf32, #tpu.memory_space<vmem>>, vector<8x784xf32>
    %1 = arith.truncf %0 : vector<8x784xf32> to vector<8x784xbf16>
    %c0_1 = arith.constant 0 : index
    %c0_2 = arith.constant 0 : index
    %2 = vector.load %arg2[%c0_1, %c0_2] : memref<784x128xbf16, #tpu.memory_space<vmem>>, vector<784x128xbf16>
    %c0_3 = arith.constant 0 : index
    %c0_4 = arith.constant 0 : index
    %3 = vector.load %arg3[%c0_3, %c0_4] : memref<1x128xf32, #tpu.memory_space<vmem>>, vector<1x128xf32>
    %cst = arith.constant dense<0.000000e+00> : vector<8x128xf32>
    %4 = tpu.matmul %1, %2, %cst {dimension_numbers = #tpu.dot_dimension_numbers<[1], [0], [0], [1], [0, 0, 1, 1], [], []>} : vector<8x784xbf16>, vector<784x128xbf16>, vector<8x128xf32> -> vector<8x128xf32>
    %5 = vector.broadcast %3 : vector<1x128xf32> to vector<8x128xf32>
    %6 = arith.addf %4, %5 : vector<8x128xf32>
    %cst_5 = arith.constant 0.000000e+00 : f32
    %7 = vector.broadcast %cst_5 : f32 to vector<8x128xf32>
    %8 = arith.maximumf %6, %7 : vector<8x128xf32>
    %9 = arith.truncf %8 : vector<8x128xf32> to vector<8x128xbf16>
    %c0_6 = arith.constant 0 : index
    %c0_7 = arith.constant 0 : index
    %10 = vector.load %arg4[%c0_6, %c0_7] : memref<128x128xbf16, #tpu.memory_space<vmem>>, vector<128x128xbf16>
    %c0_8 = arith.constant 0 : index
    %c0_9 = arith.constant 0 : index
    %11 = vector.load %arg5[%c0_8, %c0_9] : memref<1x128xf32, #tpu.memory_space<vmem>>, vector<1x128xf32>
    %cst_10 = arith.constant dense<0.000000e+00> : vector<8x128xf32>
    %12 = tpu.matmul %9, %10, %cst_10 {dimension_numbers = #tpu.dot_dimension_numbers<[1], [0], [0], [1], [0, 0, 1, 1], [], []>} : vector<8x128xbf16>, vector<128x128xbf16>, vector<8x128xf32> -> vector<8x128xf32>
    %13 = vector.broadcast %11 : vector<1x128xf32> to vector<8x128xf32>
    %14 = arith.addf %12, %13 : vector<8x128xf32>
    %cst_11 = arith.constant 0.000000e+00 : f32
    %15 = vector.broadcast %cst_11 : f32 to vector<8x128xf32>
    %16 = arith.maximumf %14, %15 : vector<8x128xf32>
    %17 = arith.truncf %16 : vector<8x128xf32> to vector<8x128xbf16>
    %c0_12 = arith.constant 0 : index
    %c0_13 = arith.constant 0 : index
    %18 = vector.load %arg6[%c0_12, %c0_13] : memref<128x128xbf16, #tpu.memory_space<vmem>>, vector<128x128xbf16>
    %c0_14 = arith.constant 0 : index
    %c0_15 = arith.constant 0 : index
    %19 = vector.load %arg7[%c0_14, %c0_15] : memref<1x128xf32, #tpu.memory_space<vmem>>, vector<1x128xf32>
    %cst_16 = arith.constant dense<0.000000e+00> : vector<8x128xf32>
    %20 = tpu.matmul %17, %18, %cst_16 {dimension_numbers = #tpu.dot_dimension_numbers<[1], [0], [0], [1], [0, 0, 1, 1], [], []>} : vector<8x128xbf16>, vector<128x128xbf16>, vector<8x128xf32> -> vector<8x128xf32>
    %21 = vector.broadcast %19 : vector<1x128xf32> to vector<8x128xf32>
    %22 = arith.addf %20, %21 : vector<8x128xf32>
    %cst_17 = arith.constant 0.000000e+00 : f32
    %23 = vector.broadcast %cst_17 : f32 to vector<8x128xf32>
    %24 = arith.maximumf %22, %23 : vector<8x128xf32>
    %25 = arith.truncf %24 : vector<8x128xf32> to vector<8x128xbf16>
    %c0_18 = arith.constant 0 : index
    %c0_19 = arith.constant 0 : index
    %26 = vector.load %arg8[%c0_18, %c0_19] : memref<128x128xbf16, #tpu.memory_space<vmem>>, vector<128x128xbf16>
    %c0_20 = arith.constant 0 : index
    %c0_21 = arith.constant 0 : index
    %27 = vector.load %arg9[%c0_20, %c0_21] : memref<1x128xf32, #tpu.memory_space<vmem>>, vector<1x128xf32>
    %cst_22 = arith.constant dense<0.000000e+00> : vector<8x128xf32>
    %28 = tpu.matmul %25, %26, %cst_22 {dimension_numbers = #tpu.dot_dimension_numbers<[1], [0], [0], [1], [0, 0, 1, 1], [], []>} : vector<8x128xbf16>, vector<128x128xbf16>, vector<8x128xf32> -> vector<8x128xf32>
    %29 = vector.broadcast %27 : vector<1x128xf32> to vector<8x128xf32>
    %30 = arith.addf %28, %29 : vector<8x128xf32>
    %cst_23 = arith.constant 0.000000e+00 : f32
    %31 = vector.broadcast %cst_23 : f32 to vector<8x128xf32>
    %32 = arith.maximumf %30, %31 : vector<8x128xf32>
    %33 = arith.truncf %32 : vector<8x128xf32> to vector<8x128xbf16>
    %c0_24 = arith.constant 0 : index
    %c0_25 = arith.constant 0 : index
    %34 = vector.load %arg10[%c0_24, %c0_25] : memref<128x128xbf16, #tpu.memory_space<vmem>>, vector<128x128xbf16>
    %c0_26 = arith.constant 0 : index
    %c0_27 = arith.constant 0 : index
    %35 = vector.load %arg11[%c0_26, %c0_27] : memref<1x128xf32, #tpu.memory_space<vmem>>, vector<1x128xf32>
    %cst_28 = arith.constant dense<0.000000e+00> : vector<8x128xf32>
    %36 = tpu.matmul %33, %34, %cst_28 {dimension_numbers = #tpu.dot_dimension_numbers<[1], [0], [0], [1], [0, 0, 1, 1], [], []>} : vector<8x128xbf16>, vector<128x128xbf16>, vector<8x128xf32> -> vector<8x128xf32>
    %37 = vector.broadcast %35 : vector<1x128xf32> to vector<8x128xf32>
    %38 = arith.addf %36, %37 : vector<8x128xf32>
    %cst_29 = arith.constant 0.000000e+00 : f32
    %39 = vector.broadcast %cst_29 : f32 to vector<8x128xf32>
    %40 = arith.maximumf %38, %39 : vector<8x128xf32>
    %41 = arith.truncf %40 : vector<8x128xf32> to vector<8x128xbf16>
    %c0_30 = arith.constant 0 : index
    %c0_31 = arith.constant 0 : index
    %42 = vector.load %arg12[%c0_30, %c0_31] : memref<128x128xbf16, #tpu.memory_space<vmem>>, vector<128x128xbf16>
    %c0_32 = arith.constant 0 : index
    %c0_33 = arith.constant 0 : index
    %43 = vector.load %arg13[%c0_32, %c0_33] : memref<1x128xf32, #tpu.memory_space<vmem>>, vector<1x128xf32>
    %cst_34 = arith.constant dense<0.000000e+00> : vector<8x128xf32>
    %44 = tpu.matmul %41, %42, %cst_34 {dimension_numbers = #tpu.dot_dimension_numbers<[1], [0], [0], [1], [0, 0, 1, 1], [], []>} : vector<8x128xbf16>, vector<128x128xbf16>, vector<8x128xf32> -> vector<8x128xf32>
    %45 = vector.broadcast %43 : vector<1x128xf32> to vector<8x128xf32>
    %46 = arith.addf %44, %45 : vector<8x128xf32>
    %cst_35 = arith.constant 0.000000e+00 : f32
    %47 = vector.broadcast %cst_35 : f32 to vector<8x128xf32>
    %48 = arith.maximumf %46, %47 : vector<8x128xf32>
    %49 = arith.truncf %48 : vector<8x128xf32> to vector<8x128xbf16>
    %c0_36 = arith.constant 0 : index
    %c0_37 = arith.constant 0 : index
    %50 = vector.load %arg14[%c0_36, %c0_37] : memref<128x784xbf16, #tpu.memory_space<vmem>>, vector<128x784xbf16>
    %c0_38 = arith.constant 0 : index
    %c0_39 = arith.constant 0 : index
    %51 = vector.load %arg15[%c0_38, %c0_39] : memref<1x784xf32, #tpu.memory_space<vmem>>, vector<1x784xf32>
    %cst_40 = arith.constant dense<0.000000e+00> : vector<8x784xf32>
    %52 = tpu.matmul %49, %50, %cst_40 {dimension_numbers = #tpu.dot_dimension_numbers<[1], [0], [0], [1], [0, 0, 1, 1], [], []>} : vector<8x128xbf16>, vector<128x784xbf16>, vector<8x784xf32> -> vector<8x784xf32>
    %53 = vector.broadcast %51 : vector<1x784xf32> to vector<8x784xf32>
    %54 = arith.addf %52, %53 : vector<8x784xf32>
    %cst_41 = arith.constant 5.000000e-01 : f32
    %55 = vector.broadcast %cst_41 : f32 to vector<8x784xf32>
    %56 = arith.mulf %55, %54 : vector<8x784xf32>
    %57 = math.tanh %56 : vector<8x784xf32>
    %cst_42 = arith.constant 1.000000e+00 : f32
    %58 = vector.broadcast %cst_42 : f32 to vector<8x784xf32>
    %59 = arith.addf %57, %58 : vector<8x784xf32>
    %cst_43 = arith.constant 5.000000e-01 : f32
    %60 = vector.broadcast %cst_43 : f32 to vector<8x784xf32>
    %61 = arith.mulf %60, %59 : vector<8x784xf32>
    %62 = arith.truncf %61 : vector<8x784xf32> to vector<8x784xbf16>
    %c0_44 = arith.constant 0 : index
    %c0_45 = arith.constant 0 : index
    %63 = vector.load %arg16[%c0_44, %c0_45] : memref<8x784xbf16, #tpu.memory_space<vmem>>, vector<8x784xbf16>
    tpu.vector_store %arg16[%c0_44, %c0_45], %62 {strides = array<i32>} : memref<8x784xbf16, #tpu.memory_space<vmem>>, vector<8x784xbf16>,
    return
  }
  func.func @transform_0(%arg0: i32) -> (i32, i32) {
    %c0_i32 = arith.constant 0 : i32
    %c0_i32_0 = arith.constant 0 : i32
    return %arg0, %c0_i32 : i32, i32
  }
  func.func @transform_1(%arg0: i32) -> (i32, i32) {
    %c0_i32 = arith.constant 0 : i32
    %c0_i32_0 = arith.constant 0 : i32
    %c0_i32_1 = arith.constant 0 : i32
    return %c0_i32, %c0_i32_0 : i32, i32
  }
  func.func @transform_2(%arg0: i32) -> (i32, i32) {
    %c0_i32 = arith.constant 0 : i32
    %c0_i32_0 = arith.constant 0 : i32
    %c0_i32_1 = arith.constant 0 : i32
    return %c0_i32, %c0_i32_0 : i32, i32
  }
  func.func @transform_3(%arg0: i32) -> (i32, i32) {
    %c0_i32 = arith.constant 0 : i32
    %c0_i32_0 = arith.constant 0 : i32
    %c0_i32_1 = arith.constant 0 : i32
    return %c0_i32, %c0_i32_0 : i32, i32
  }
  func.func @transform_4(%arg0: i32) -> (i32, i32) {
    %c0_i32 = arith.constant 0 : i32
    %c0_i32_0 = arith.constant 0 : i32
    %c0_i32_1 = arith.constant 0 : i32
    return %c0_i32, %c0_i32_0 : i32, i32
  }
  func.func @transform_5(%arg0: i32) -> (i32, i32) {
    %c0_i32 = arith.constant 0 : i32
    %c0_i32_0 = arith.constant 0 : i32
    %c0_i32_1 = arith.constant 0 : i32
    return %c0_i32, %c0_i32_0 : i32, i32
  }
  func.func @transform_6(%arg0: i32) -> (i32, i32) {
    %c0_i32 = arith.constant 0 : i32
    %c0_i32_0 = arith.constant 0 : i32
    %c0_i32_1 = arith.constant 0 : i32
    return %c0_i32, %c0_i32_0 : i32, i32
  }
  func.func @transform_7(%arg0: i32) -> (i32, i32) {
    %c0_i32 = arith.constant 0 : i32
    %c0_i32_0 = arith.constant 0 : i32
    %c0_i32_1 = arith.constant 0 : i32
    return %c0_i32, %c0_i32_0 : i32, i32
  }
  func.func @transform_8(%arg0: i32) -> (i32, i32) {
    %c0_i32 = arith.constant 0 : i32
    %c0_i32_0 = arith.constant 0 : i32
    %c0_i32_1 = arith.constant 0 : i32
    return %c0_i32, %c0_i32_0 : i32, i32
  }
  func.func @transform_9(%arg0: i32) -> (i32, i32) {
    %c0_i32 = arith.constant 0 : i32
    %c0_i32_0 = arith.constant 0 : i32
    %c0_i32_1 = arith.constant 0 : i32
    return %c0_i32, %c0_i32_0 : i32, i32
  }
  func.func @transform_10(%arg0: i32) -> (i32, i32) {
    %c0_i32 = arith.constant 0 : i32
    %c0_i32_0 = arith.constant 0 : i32
    %c0_i32_1 = arith.constant 0 : i32
    return %c0_i32, %c0_i32_0 : i32, i32
  }
  func.func @transform_11(%arg0: i32) -> (i32, i32) {
    %c0_i32 = arith.constant 0 : i32
    %c0_i32_0 = arith.constant 0 : i32
    %c0_i32_1 = arith.constant 0 : i32
    return %c0_i32, %c0_i32_0 : i32, i32
  }
  func.func @transform_12(%arg0: i32) -> (i32, i32) {
    %c0_i32 = arith.constant 0 : i32
    %c0_i32_0 = arith.constant 0 : i32
    %c0_i32_1 = arith.constant 0 : i32
    return %c0_i32, %c0_i32_0 : i32, i32
  }
  func.func @transform_13(%arg0: i32) -> (i32, i32) {
    %c0_i32 = arith.constant 0 : i32
    %c0_i32_0 = arith.constant 0 : i32
    %c0_i32_1 = arith.constant 0 : i32
    return %c0_i32, %c0_i32_0 : i32, i32
  }
  func.func @transform_14(%arg0: i32) -> (i32, i32) {
    %c0_i32 = arith.constant 0 : i32
    %c0_i32_0 = arith.constant 0 : i32
    %c0_i32_1 = arith.constant 0 : i32
    return %c0_i32, %c0_i32_0 : i32, i32
  }
  func.func @transform_15(%arg0: i32) -> (i32, i32) {
    %c0_i32 = arith.constant 0 : i32
    %c0_i32_0 = arith.constant 0 : i32
    return %arg0, %c0_i32 : i32, i32
  }
}

</mosaic_0001>

<bundles_post_ra>
// kernel: linear_autoencoder.1
= control target key start
LH: loop header
LB: loop body
LE: loop exit
PB: predicated region body
PF: predicated region fallthrough
CT: control target
= control target key end

     0   :  { %s2988_s0 = inlined_call_operand.vmem [shape: f32[8,784], index: 0, kind: input, shape index: {}]   ;;  %s2989_s1 = inlined_call_operand.vmem [shape: bf16[784,128], index: 1, kind: input, shape index: {}]   ;;  %s2990_s2 = inlined_call_operand.vmem [shape: f32[1,128], index: 2, kind: input, shape index: {}]   ;;  %s2991_s3 = inlined_call_operand.vmem [shape: bf16[128,128], index: 3, kind: input, shape index: {}]   ;;  %s2992_s4 = inlined_call_operand.vmem [shape: f32[1,128], index: 4, kind: input, shape index: {}]   ;;  %s2993_s5 = inlined_call_operand.vmem [shape: bf16[128,128], index: 5, kind: input, shape index: {}]   ;;  %s2994_s6 = inlined_call_operand.vmem [shape: f32[1,128], index: 6, kind: input, shape index: {}]   ;;  %s2995_s7 = inlined_call_operand.vmem [shape: bf16[128,128], index: 7, kind: input, shape index: {}]   ;;  %s2996_s8 = inlined_call_operand.vmem [shape: f32[1,128], index: 8, kind: input, shape index: {}]   ;;  %s2997_s9 = inlined_call_operand.vmem [shape: bf16[128,128], index: 9, kind: input, shape index: {}]   ;;  %s2998_s10 = inlined_call_operand.vmem [shape: f32[1,128], index: 10, kind: input, shape index: {}]   ;;  %s2999_s11 = inlined_call_operand.vmem [shape: bf16[128,128], index: 11, kind: input, shape index: {}]   ;;  %s3000_s12 = inlined_call_operand.vmem [shape: f32[1,128], index: 12, kind: input, shape index: {}]   ;;  %s3001_s13 = inlined_call_operand.vmem [shape: bf16[128,784], index: 13, kind: input, shape index: {}]   ;;  %s3002_s14 = inlined_call_operand.vmem [shape: f32[1,784], index: 14, kind: input, shape index: {}]   ;;  %s3003_s15 = inlined_call_operand.hbm [shape: bf16[8,784], index: 15, kind: output, shape index: {}]  }
   0x1   :  { %v2074_v0 = vld [vmem:[%s2989_s1 + $0x38] sm:$0xff]  ;;  %v2073_v3 = vld [vmem:[%s2989_s1 + $0x30] sm:$0xff]  ;;  %v2072_v8 = vld [vmem:[%s2989_s1 + $0x28] sm:$0xff] }
   0x2   :  { %v2082_v1 = vld [vmem:[%s2989_s1 + $0x78] sm:$0xff]  ;;  %466 = vmatpush.bf16.msra.mxu0 %v2074_v0  ;;  %v2081_v4 = vld [vmem:[%s2989_s1 + $0x70] sm:$0xff]  ;;  %v2080_v9 = vld [vmem:[%s2989_s1 + $0x68] sm:$0xff] }
   0x3   :  { %v2090_v2 = vld [vmem:[%s2989_s1 + $0xb8] sm:$0xff]  ;;  %479 = vmatpush.bf16.msra.mxu1 %v2082_v1  ;;  %v2089_v5 = vld [vmem:[%s2989_s1 + $0xb0] sm:$0xff]  ;;  %v2088_v10 = vld [vmem:[%s2989_s1 + $0xa8] sm:$0xff] }
   0x4   :  { %492 = vmatpush.bf16.msra.mxu2 %v2090_v2  ;;  %v2098_v6 = vld [vmem:[%s2989_s1 + $0xf8] sm:$0xff]  ;;  %v2097_v7 = vld [vmem:[%s2989_s1 + $0xf0] sm:$0xff]  ;;  %v2096_v11 = vld [vmem:[%s2989_s1 + $0xe8] sm:$0xff] }
   0x5   :  { %505 = vmatpush.bf16.msra.mxu3 %v2098_v6  ;;  %v2071_v12 = vld [vmem:[%s2989_s1 + $0x20] sm:$0xff]  ;;  %v2070_v16 = vld [vmem:[%s2989_s1 + $0x18] sm:$0xff]  ;;  %v2069_v19 = vld [vmem:[%s2989_s1 + $0x10] sm:$0xff] }
   0x6   :  { %467 = vmatpush.bf16.msra.mxu0 %v2073_v3  ;;  %v2079_v13 = vld [vmem:[%s2989_s1 + $0x60] sm:$0xff]  ;;  %v2078_v17 = vld [vmem:[%s2989_s1 + $0x58] sm:$0xff]  ;;  %v2077_v20 = vld [vmem:[%s2989_s1 + $0x50] sm:$0xff] }
   0x7   :  { %480 = vmatpush.bf16.msra.mxu1 %v2081_v4  ;;  %v2087_v14 = vld [vmem:[%s2989_s1 + $0xa0] sm:$0xff]  ;;  %v2086_v18 = vld [vmem:[%s2989_s1 + $0x98] sm:$0xff] }
   0x8   :  { %493 = vmatpush.bf16.msra.mxu2 %v2089_v5  ;;  %v2095_v15 = vld [vmem:[%s2989_s1 + $0xe0] sm:$0xff]  ;;  %v2094_v21 = vld [vmem:[%s2989_s1 + $0xd8] sm:$0xff] }
   0x9   :  { %506 = vmatpush.bf16.msra.mxu3 %v2097_v7 }
   0xa   :  { %468 = vmatpush.bf16.msra.mxu0 %v2072_v8 }
   0xb   :  { %481 = vmatpush.bf16.msra.mxu1 %v2080_v9 }
   0xc   :  { %494 = vmatpush.bf16.msra.mxu2 %v2088_v10 }
   0xd   :  { %507 = vmatpush.bf16.msra.mxu3 %v2096_v11 }
   0xe   :  { %469 = vmatpush.bf16.msra.mxu0 %v2071_v12 }
   0xf   :  { %482 = vmatpush.bf16.msra.mxu1 %v2079_v13 }
  0x10   :  { %495 = vmatpush.bf16.msra.mxu2 %v2087_v14 }
  0x11   :  { %508 = vmatpush.bf16.msra.mxu3 %v2095_v15 }
  0x12   :  { %470 = vmatpush.bf16.msra.mxu0 %v2070_v16 }
  0x13   :  { %483 = vmatpush.bf16.msra.mxu1 %v2078_v17 }
  0x14   :  { %20 = vsyncpa [#allocation3], 0  ;;  %496 = vmatpush.bf16.msra.mxu2 %v2086_v18  ;;  %v2085_v22 = vld [vmem:[%s2989_s1 + $0x90] sm:$0xff]  ;;  %v2068_v24 = vld [vmem:[%s2989_s1 + $0x8] sm:$0xff]  ;;  %vm462_vm0 = vcmask 130048   ;;  %vm1468_vm1 = vcmask 125952  }
  0x15   :  { %509 = vmatpush.bf16.msra.mxu3 %v2094_v21  ;;  %v2093_v23 = vld [vmem:[%s2989_s1 + $0xd0] sm:$0xff]  ;;  %v2076_v25 = vld [vmem:[%s2989_s1 + $0x48] sm:$0xff]  ;;  %v2067_v27 = vld [vmem:[%s2989_s1] sm:$0xff] }
  0x16   :  { %471 = vmatpush.bf16.msra.mxu0 %v2069_v19  ;;  %v2084_v26 = vld [vmem:[%s2989_s1 + $0x88] sm:$0xff]  ;;  %v2075_v29 = vld [vmem:[%s2989_s1 + $0x40] sm:$0xff]  ;;  %v2106_v32 = vld [vmem:[%s2989_s1 + $0x138] sm:$0xff] }
  0x17   :  { %484 = vmatpush.bf16.msra.mxu1 %v2077_v20  ;;  %v2092_v28 = vld [vmem:[%s2989_s1 + $0xc8] sm:$0xff]  ;;  %v52_v30 = vld [vmem:[%s2988_s0] sm:$0xff]  ;;  %v2114_v33 = vld [vmem:[%s2989_s1 + $0x178] sm:$0xff] }
  0x18   :  { %497 = vmatpush.bf16.msra.mxu2 %v2085_v22  ;;  %v53_v31 = vld [vmem:[%s2988_s0 + $0x8] sm:$0xff]  ;;  %v2083_v34 = vld [vmem:[%s2989_s1 + $0x80] sm:$0xff]  ;;  %v54_v35 = vld [vmem:[%s2988_s0 + $0x10] sm:$0xff]  ;;  %v59_v36 = vpack.c.bf16 %v52_v30, %v52_v30 }
  0x19   :  { %510 = vmatpush.bf16.msra.mxu3 %v2093_v23  ;;  %v60_v37 = vpack.c.bf16 %v53_v31, %v53_v31  ;;  %v2091_v38 = vld [vmem:[%s2989_s1 + $0xc0] sm:$0xff]  ;;  %v55_v40 = vld [vmem:[%s2988_s0 + $0x18] sm:$0xff]  ;;  %v2105_v41 = vld [vmem:[%s2989_s1 + $0x130] sm:$0xff]  ;;  %v61_v43 = vpack.c.bf16 %v54_v35, %v54_v35 }
  0x1a   :  { %472 = vmatpush.bf16.msra.mxu0 %v2068_v24  ;;  %v2115_v39 = vld [vmem:[%s2989_s1 + $0x180] sm:$0xff]  ;;  %v2113_v42 = vld [vmem:[%s2989_s1 + $0x170] sm:$0xff]  ;;  %v62_v44 = vpack.c.bf16 %v55_v40, %v55_v40  ;;  %v2104_v45 = vld [vmem:[%s2989_s1 + $0x128] sm:$0xff] }
  0x1b   :  { %485 = vmatpush.bf16.msra.mxu1 %v2076_v25  ;;  %v2112_v46 = vld [vmem:[%s2989_s1 + $0x168] sm:$0xff]  ;;  %v2103_v47 = vld [vmem:[%s2989_s1 + $0x120] sm:$0xff]  ;;  %v2102_v49 = vld [vmem:[%s2989_s1 + $0x118] sm:$0xff] }
  0x1c   :  { %498 = vmatpush.bf16.msra.mxu2 %v2084_v26  ;;  %v2111_v48 = vld [vmem:[%s2989_s1 + $0x160] sm:$0xff]  ;;  %v2110_v50 = vld [vmem:[%s2989_s1 + $0x158] sm:$0xff]  ;;  %v58_v51 = vld [vmem:[%s2988_s0 + $0x30] sm:$0xff] }
  0x1d   :  { %511 = vmatpush.bf16.msra.mxu3 %v2092_v28  ;;  %v2101_v52 = vld [vmem:[%s2989_s1 + $0x110] sm:$0xff]  ;;  %v65_v54 = vpack.c.bf16 %v58_v51, %v58_v51  ;;  %v2100_v55 = vld [vmem:[%s2989_s1 + $0x108] sm:$0xff]  ;;  %v2099_v57 = vld [vmem:[%s2989_s1 + $0x100] sm:$0xff] }
  0x1e   :  { %473 = vmatpush.bf16.msra.mxu0 %v2067_v27  ;;  %v2109_v53 = vld [vmem:[%s2989_s1 + $0x150] sm:$0xff]  ;;  %v2108_v56 = vld [vmem:[%s2989_s1 + $0x148] sm:$0xff]  ;;  %v2107_v58 = vld [vmem:[%s2989_s1 + $0x140] sm:$0xff] }
  0x1f   :  { %486 = vmatpush.bf16.msra.mxu1 %v2075_v29  ;;  %v56_v59 = vld [vmem:[%s2988_s0 + $0x20] sm:$0xff]  ;;  %v57_v60 = vld [vmem:[%s2988_s0 + $0x28] sm:$0xff]  ;;  %v2123_v63 = vld [vmem:[%s2991_s3 + $0x38] sm:$0xff] }
  0x20   :  { %499 = vmatpush.bf16.msra.mxu2 %v2083_v34  ;;  %v63_v61 = vpack.c.bf16 %v56_v59, %v56_v59  ;;  %v64_v62 = vpack.c.bf16 %v57_v60, %v57_v60  ;;  %v2122_v0 = vld [vmem:[%s2991_s3 + $0x30] sm:$0xff]  ;;  %v2121_v1 = vld [vmem:[%s2991_s3 + $0x28] sm:$0xff]  ;;  %v2120_v2 = vld [vmem:[%s2991_s3 + $0x20] sm:$0xff] }
  0x21   :  { %474 = vmatmul.bf16.vlgmr.msra.gmra.mxu0 %v59_v36  ;;  %512 = vmatpush.bf16.msra.mxu3 %v2091_v38  ;;  %v2119_v3 = vld [vmem:[%s2991_s3 + $0x18] sm:$0xff]  ;;  %v2118_v4 = vld [vmem:[%s2991_s3 + $0x10] sm:$0xff]  ;;  %v2117_v5 = vld [vmem:[%s2991_s3 + $0x8] sm:$0xff] }
  0x22   :  { %518 = vmatpush.bf16.msrb.mxu0 %v2106_v32  ;;  %487 = vmatmul.bf16.vlgmr.msra.gmra.mxu1 %v60_v37  ;;  %v2116_v8 = vld [vmem:[%s2991_s3] sm:$0xff]  ;;  %v2131_v11 = vld [vmem:[%s2993_s5 + $0x38] sm:$0xff]  ;;  %v2130_v14 = vld [vmem:[%s2993_s5 + $0x30] sm:$0xff] }
  0x23   :  { %531 = vmatpush.bf16.msrb.mxu1 %v2114_v33  ;;  %500 = vmatmul.bf16.vlgmr.msra.gmra.mxu2 %v61_v43  ;;  %v2213_v15 = vld [vmem:[%s2990_s2] ss:$0 sm:$0xff]  ;;  %v2129_v16 = vld [vmem:[%s2993_s5 + $0x28] sm:$0xff]  ;;  %v2127_v22 = vld [vmem:[%s2993_s5 + $0x18] sm:$0xff] }
  0x24   :  { %551 = vmatpush.bf16.msrb.mxu2 %v2115_v39  ;;  %513 = vmatmul.bf16.vlgmr.msra.gmra.mxu3 %v62_v44  ;;  %v2128_v20 = vld [vmem:[%s2993_s5 + $0x20] sm:$0xff]  ;;  %v2126_v25 = vld [vmem:[%s2993_s5 + $0x10] sm:$0xff]  ;;  %v2125_v37 = vld [vmem:[%s2993_s5 + $0x8] sm:$0xff] }
  0x25   :  { %627 = vmatpush.bf16.msrb.mxu3 %v2123_v63  ;;  %v2124_v38 = vld [vmem:[%s2993_s5] sm:$0xff]  ;;  %v2139_v39 = vld [vmem:[%s2995_s7 + $0x38] sm:$0xff]  ;;  %v2138_v40 = vld [vmem:[%s2995_s7 + $0x30] sm:$0xff] }
  0x26   :  { %519 = vmatpush.bf16.msrb.mxu0 %v2105_v41  ;;  %v2137_v41 = vld [vmem:[%s2995_s7 + $0x28] sm:$0xff]  ;;  %v2135_v43 = vld [vmem:[%s2995_s7 + $0x18] sm:$0xff]  ;;  %v2134_v44 = vld [vmem:[%s2995_s7 + $0x10] sm:$0xff] }
  0x27   :  { %532 = vmatpush.bf16.msrb.mxu1 %v2113_v42  ;;  %v2136_v42 = vld [vmem:[%s2995_s7 + $0x20] sm:$0xff]  ;;  %v2133_v51 = vld [vmem:[%s2995_s7 + $0x8] sm:$0xff] }
  0x28   :  { %710 = vmatpush.bf16.msra.mxu2 %v2131_v11  ;;  %v2215_v59 = vld [vmem:[%s2994_s6] ss:$0 sm:$0xff] }
  0x29   :  { %628 = vmatpush.bf16.msrb.mxu3 %v2122_v0 }
  0x2a   :  { %520 = vmatpush.bf16.msrb.mxu0 %v2104_v45  ;;  %v2214_v45 = vld [vmem:[%s2992_s4] ss:$0 sm:$0xff] }
  0x2b   :  { %533 = vmatpush.bf16.msrb.mxu1 %v2112_v46 }
  0x2c   :  { %711 = vmatpush.bf16.msra.mxu2 %v2130_v14 }
  0x2d   :  { %629 = vmatpush.bf16.msrb.mxu3 %v2121_v1  ;;  %v2141_v1 = vld [vmem:[%s2997_s9 + $0x8] sm:$0xff] }
  0x2e   :  { %521 = vmatpush.bf16.msrb.mxu0 %v2103_v47 }
  0x2f   :  { %534 = vmatpush.bf16.msrb.mxu1 %v2111_v48 }
  0x30   :  { %712 = vmatpush.bf16.msra.mxu2 %v2129_v16  ;;  %v2148_v16 = vld [vmem:[%s2999_s11] sm:$0xff] }
  0x31   :  { %630 = vmatpush.bf16.msrb.mxu3 %v2120_v2  ;;  %v2140_v2 = vld [vmem:[%s2997_s9] sm:$0xff] }
  0x32   :  { %522 = vmatpush.bf16.msrb.mxu0 %v2102_v49 }
  0x33   :  { %535 = vmatpush.bf16.msrb.mxu1 %v2110_v50  ;;  %1682 = vmatmul.msk.bf16.vlgmr.msrb.gmra.mxu2 %vm462_vm0, %v65_v54  ;;  %v2146_v54 = vld [vmem:[%s2997_s9 + $0x30] sm:$0xff] }
  0x34   :  { %713 = vmatpush.bf16.msra.mxu2 %v2128_v20 }
  0x35   :  { %631 = vmatpush.bf16.msrb.mxu3 %v2119_v3  ;;  %v2155_v3 = vld [vmem:[%s2999_s11 + $0x38] sm:$0xff] }
  0x36   :  { %523 = vmatpush.bf16.msrb.mxu0 %v2101_v52  ;;  %v2132_v52 = vld [vmem:[%s2995_s7] sm:$0xff] }
  0x37   :  { %536 = vmatpush.bf16.msrb.mxu1 %v2109_v53  ;;  %v2147_v53 = vld [vmem:[%s2997_s9 + $0x38] sm:$0xff] }
  0x38   :  { %714 = vmatpush.bf16.msra.mxu2 %v2127_v22  ;;  %v2049_v22 = vld [vmem:[%s3001_s13 + $0x190] sm:$0xf] }
  0x39   :  { %632 = vmatpush.bf16.msrb.mxu3 %v2118_v4  ;;  %v2154_v4 = vld [vmem:[%s2999_s11 + $0x30] sm:$0xff] }
  0x3a   :  { %524 = vmatpush.bf16.msrb.mxu0 %v2100_v55  ;;  %v2145_v55 = vld [vmem:[%s2997_s9 + $0x28] sm:$0xff] }
  0x3b   :  { %537 = vmatpush.bf16.msrb.mxu1 %v2108_v56  ;;  %v2144_v56 = vld [vmem:[%s2997_s9 + $0x20] sm:$0xff] }
  0x3c   :  { %715 = vmatpush.bf16.msra.mxu2 %v2126_v25 }
  0x3d   :  { %633 = vmatpush.bf16.msrb.mxu3 %v2117_v5  ;;  %v2153_v5 = vld [vmem:[%s2999_s11 + $0x28] sm:$0xff] }
  0x3e   :  { %525 = vmatpush.bf16.msrb.mxu0 %v2099_v57  ;;  %v2143_v57 = vld [vmem:[%s2997_s9 + $0x18] sm:$0xff] }
  0x3f   :  { %538 = vmatpush.bf16.msrb.mxu1 %v2107_v58  ;;  %v2142_v58 = vld [vmem:[%s2997_s9 + $0x10] sm:$0xff] }
  0x40   :  { %716 = vmatpush.bf16.msra.mxu2 %v2125_v37  ;;  %v2191_v37 = vld [vmem:[%s3001_s13 + $0x11c] sm:$0xf] }
  0x41   :  { %526 = vmatmul.bf16.vlgmr.msrb.gmra.mxu0 %v63_v61  ;;  %634 = vmatpush.bf16.msrb.mxu3 %v2116_v8  ;;  %v2150_v8 = vld [vmem:[%s2999_s11 + $0x10] sm:$0xff] }
  0x42   :  { %539 = vmatmul.bf16.vlgmr.msrb.gmra.mxu1 %v64_v62  ;;  %793 = vmatpush.bf16.msra.mxu0 %v2139_v39  ;;  %v1993_v39 = vld [vmem:[%s3001_s13 + $0x120] sm:$0xf] }
  0x43   :  { %876 = vmatpush.bf16.msra.mxu1 %v2147_v53  ;;  %v2199_v53 = vld [vmem:[%s3001_s13 + $0x15c] sm:$0xf] }
  0x44   :  { %717 = vmatpush.bf16.msra.mxu2 %v2124_v38  ;;  %v1987_v38 = vld [vmem:[%s3001_s13 + $0x134] sm:$0xf0] }
  0x45   :  { %959 = vmatpush.bf16.msra.mxu3 %v2155_v3 }
  0x46   :  { %794 = vmatpush.bf16.msra.mxu0 %v2138_v40  ;;  %v2195_v40 = vld [vmem:[%s3001_s13 + $0x138] sm:$0xf0] }
  0x47   :  { %877 = vmatpush.bf16.msra.mxu1 %v2146_v54 }
  0x49   :  { %960 = vmatpush.bf16.msra.mxu3 %v2154_v4  ;;  %v1901_v4 = vld [vmem:[%s3001_s13 + $0x70] sm:$0xf] }
  0x4a   :  { %795 = vmatpush.bf16.msra.mxu0 %v2137_v41 }
  0x4b   :  { %878 = vmatpush.bf16.msra.mxu1 %v2145_v55  ;;  %v1929_v55 = vld [vmem:[%s3001_s13 + $0xa8] sm:$0xf] }
  0x4d   :  { %961 = vmatpush.bf16.msra.mxu3 %v2153_v5  ;;  %v2173_v5 = vld [vmem:[%s3001_s13 + $0x88] sm:$0xf0] }
  0x4e   :  { %796 = vmatpush.bf16.msra.mxu0 %v2136_v42  ;;  %v1957_v42 = vld [vmem:[%s3001_s13 + $0xe0] sm:$0xf] }
  0x4f   :  { %879 = vmatpush.bf16.msra.mxu1 %v2144_v56  ;;  %v2180_v56 = vld [vmem:[%s3001_s13 + $0xc0] sm:$0xf0] }
  0x50   :  { %v1930_v3 = vor.u32 %v2180_v56, %v1929_v55  ;;  %v2029_v55 = vld [vmem:[%s3001_s13 + $0x160] sm:$0xf] }
  0x52   :  { %797 = vmatpush.bf16.msra.mxu0 %v2135_v43  ;;  %v2187_v43 = vld [vmem:[%s3001_s13 + $0xf8] sm:$0xf0] }
  0x53   :  { %880 = vmatpush.bf16.msra.mxu1 %v2143_v57  ;;  %v1958_v54 = vor.u32 %v2187_v43, %v1957_v42  ;;  %v2023_v57 = vld [vmem:[%s3001_s13 + $0x174] sm:$0xf0]  ;;  %v2207_v42 = vld [vmem:[%s3001_s13 + $0x19c] sm:$0xf] }
  0x54   :  { %v2059_v43 = vld [vmem:[%s3001_s13 + $0x1b4] sm:$0xf0] }
  0x56   :  { %798 = vmatpush.bf16.msra.mxu0 %v2134_v44  ;;  %v1990_v44 = vor.u32 %v2191_v37, %v1987_v38  ;;  %v1853_v37 = vld [vmem:[%s3001_s13 + $0x8] sm:$0xf]  ;;  %v2160_v38 = vld [vmem:[%s3001_s13 + $0x20] sm:$0xf0] }
  0x57   :  { %881 = vmatpush.bf16.msra.mxu1 %v2142_v58 }
  0x5a   :  { %799 = vmatpush.bf16.msra.mxu0 %v2133_v51  ;;  %v2188_v51 = vld [vmem:[%s3001_s13 + $0x100] sm:$0xf0] }
  0x5b   :  { %882 = vmatpush.bf16.msra.mxu1 %v2141_v1  ;;  %v2192_v1 = vld [vmem:[%s3001_s13 + $0x124] sm:$0xf] }
  0x5e   :  { %800 = vmatpush.bf16.msra.mxu0 %v2132_v52 }
  0x5f   :  { %883 = vmatpush.bf16.msra.mxu1 %v2140_v2  ;;  %v1995_v2 = vld [vmem:[%s3001_s13 + $0x13c] sm:$0xf0] }
  0x9e   :  { %v475_v6 = vpop.f32.mrf.mxu0 }
  0x9f   :  { %v488_v7 = vpop.f32.mrf.mxu1  ;;  %v476_v17 = vadd.f32 %v2213_v15, %v475_v6  ;;  %v2152_v6 = vld [vmem:[%s2999_s11 + $0x20] sm:$0xff]  ;;  %v2149_v15 = vld [vmem:[%s2999_s11 + $0x8] sm:$0xff] }
  0xa0   :  { %962 = vmatpush.bf16.msra.mxu3 %v2152_v6  ;;  %v1998_v6 = vor.u32 %v2192_v1, %v1995_v2 }
  0xa1   :  { %v489_v21 = vadd.f32 %v488_v7, %v476_v17  ;;  %v2151_v7 = vld [vmem:[%s2999_s11 + $0x18] sm:$0xff]  ;;  %v2041_v17 = vld [vmem:[%s3001_s13 + $0x188] sm:$0xf] }
  0xa4   :  { %963 = vmatpush.bf16.msra.mxu3 %v2151_v7 }
  0xa6   :  { %v477_v9 = vpop.f32.mrf.mxu0  ;;  %v501_v12 = vpop.f32.mrf.mxu2 }
  0xa7   :  { %v490_v10 = vpop.f32.mrf.mxu1  ;;  %v514_v13 = vpop.f32.mrf.mxu3  ;;  %v502_v23 = vadd.f32 %v501_v12, %v489_v21  ;;  %v2216_v9 = vld [vmem:[%s2996_s8] ss:$0 sm:$0xff]  ;;  %v2043_v21 = vld [vmem:[%s3001_s13 + $0x1a4] sm:$0xf0] }
  0xa8   :  { %964 = vmatpush.bf16.msra.mxu3 %v2150_v8 }
  0xa9   :  { %v515_v26 = vadd.f32 %v514_v13, %v502_v23  ;;  %v2209_v23 = vld [vmem:[%s3001_s13 + $0x1a8] sm:$0xf0] }
  0xaa   :  { %v2050_v25 = vor.u32 %v2209_v23, %v2049_v22  ;;  %v2163_v22 = vld [vmem:[%s3001_s13 + $0x3c] sm:$0xf]  ;;  %v2178_v23 = vld [vmem:[%s3001_s13 + $0xb4] sm:$0xf] }
  0xac   :  { %965 = vmatpush.bf16.msra.mxu3 %v2149_v15  ;;  %1368 = vmatpush.bf16.msrb.mxu1 %v2050_v25  ;;  %v2217_v15 = vld [vmem:[%s2998_s10] ss:$0 sm:$0xff]  ;;  %v1875_v25 = vld [vmem:[%s3001_s13 + $0x54] sm:$0xf0]  ;;  %s1477_s10 = sshll.u32 %s3003_s15, 4  ;;  %s1478_s10 = int_to_ptr.hbm [resolvable:$true] %s1477_s10 }
  0xae   :  { %v503_v18 = vpop.f32.mrf.mxu2 }
  0xaf   :  { %v516_v19 = vpop.f32.mrf.mxu3  ;;  %v2208_v18 = vld [vmem:[%s3001_s13 + $0x1a0] sm:$0xf0] }
  0xb0   :  { %966 = vmatpush.bf16.msra.mxu3 %v2148_v16  ;;  %v2205_v19 = vld [vmem:[%s3001_s13 + $0x18c] sm:$0xf]  ;;  %v2042_v20 = vor.u32 %v2208_v18, %v2041_v17  ;;  %v1902_v16 = vor.u32 %v2173_v5, %v1901_v4  ;;  %v1873_v17 = vld [vmem:[%s3001_s13 + $0x38] sm:$0xf]  ;;  %v2166_v18 = vld [vmem:[%s3001_s13 + $0x50] sm:$0xf0] }
  0xb1   :  { %v1883_v4 = vld [vmem:[%s3001_s13 + $0x5c] sm:$0xf0]  ;;  %v2001_v5 = vld [vmem:[%s3001_s13 + $0x128] sm:$0xf] }
  0xb2   :  { %1342 = vmatpush.bf16.msrb.mxu2 %v2042_v20 }
  0xb6   :  { %v553_v24 = vpop.f32.mrf.mxu2 }
  0xbe   :  { %v527_v27 = vpop.f32.mrf.mxu0  ;;  %v555_v31 = vpop.f32.mrf.mxu2 }
  0xbf   :  { %v540_v28 = vpop.f32.mrf.mxu1  ;;  %v528_v29 = vadd.f32 %v527_v27, %v515_v26  ;;  %v2013_v26 = vld [vmem:[%s3001_s13 + $0x150] sm:$0xf]  ;;  %v2201_v27 = vld [vmem:[%s3001_s13 + $0x168] sm:$0xf0]  ;;  %v2021_v31 = vld [vmem:[%s3001_s13 + $0x158] sm:$0xf] }
  0xc1   :  { %v541_v30 = vadd.f32 %v540_v28, %v528_v29  ;;  %v2198_v28 = vld [vmem:[%s3001_s13 + $0x154] sm:$0xf]  ;;  %v2014_v29 = vor.u32 %v2201_v27, %v2013_v26  ;;  %v1881_v26 = vld [vmem:[%s3001_s13 + $0x40] sm:$0xf]  ;;  %v2167_v27 = vld [vmem:[%s3001_s13 + $0x58] sm:$0xf0] }
  0xc3   :  { %v554_v32 = vadd.f32 %v553_v24, %v541_v30  ;;  %v2046_v24 = vor.u32 %v2205_v19, %v2043_v21  ;;  %v2015_v30 = vld [vmem:[%s3001_s13 + $0x16c] sm:$0xf0]  ;;  %1343 = vmatpush.bf16.msrb.mxu2 %v2014_v29  ;;  %v1845_v29 = vld [vmem:[%s3001_s13] sm:$0xf] }
  0xc5   :  { %v557_v33 = vmax.f32 %v554_v32, 0.0  ;;  %v2202_v32 = vld [vmem:[%s3001_s13 + $0x170] sm:$0xf0]  ;;  %1355 = vmatpush.bf16.msrb.mxu0 %v2046_v24  ;;  %v1939_v24 = vld [vmem:[%s3001_s13 + $0xcc] sm:$0xf0] }
  0xc6   :  { %v529_v34 = vpop.f32.mrf.mxu0 }
  0xc7   :  { %v542_v35 = vpop.f32.mrf.mxu1  ;;  %v558_v36 = vpack.c.bf16 %v557_v33, %v557_v33  ;;  %v2018_v33 = vor.u32 %v2198_v28, %v2015_v30  ;;  %v2022_v34 = vor.u32 %v2202_v32, %v2021_v31  ;;  %v1874_v28 = vor.u32 %v2166_v18, %v1873_v17  ;;  %v2159_v30 = vld [vmem:[%s3001_s13 + $0x18] sm:$0xf0]  ;;  %v2156_v31 = vld [vmem:[%s3001_s13 + $0x4] sm:$0xf]  ;;  %v1973_v17 = vld [vmem:[%s3001_s13 + $0xf0] sm:$0xf] }
  0xc8   :  { %v1985_v35 = vld [vmem:[%s3001_s13 + $0x118] sm:$0xf]  ;;  %v1942_v32 = vor.u32 %v2178_v23, %v1939_v24 }
  0xc9   :  { %635 = vmatmul.bf16.vlgmr.msrb.gmra.mxu3 %v558_v36  ;;  %v2194_v36 = vld [vmem:[%s3001_s13 + $0x130] sm:$0xf0]  ;;  %1356 = vmatpush.bf16.msrb.mxu0 %v2018_v33  ;;  %v1981_v24 = vld [vmem:[%s3001_s13 + $0xf8] sm:$0xf] }
  0xca   :  { %v1986_v41 = vor.u32 %v2194_v36, %v1985_v35  ;;  %1369 = vmatpush.bf16.msrb.mxu1 %v2022_v34  ;;  %v1878_v34 = vor.u32 %v2163_v22, %v1875_v25  ;;  %v1882_v35 = vor.u32 %v2167_v27, %v1881_v26  ;;  %v1847_v36 = vld [vmem:[%s3001_s13 + $0x1c] sm:$0xf0]  ;;  %v2190_v25 = vld [vmem:[%s3001_s13 + $0x110] sm:$0xf0]  ;;  %v1945_v27 = vld [vmem:[%s3001_s13 + $0xb8] sm:$0xf] }
  0xcb   :  { %v1982_v26 = vor.u32 %v2190_v25, %v1981_v24 }
  0xcc   :  { %1344 = vmatpush.bf16.msrb.mxu2 %v1986_v41  ;;  %v2210_v41 = vld [vmem:[%s3001_s13 + $0x1b0] sm:$0xf0] }
  0xcd   :  { %1357 = vmatpush.bf16.msrb.mxu0 %v1990_v44  ;;  %v2065_v44 = vld [vmem:[%s3001_s13 + $0x1a0] sm:$0xf] }
  0xd0   :  { %1345 = vmatpush.bf16.msrb.mxu2 %v1958_v54  ;;  %v2062_v54 = vor.u32 %v2207_v42, %v2059_v43  ;;  %v2176_v42 = vld [vmem:[%s3001_s13 + $0xa0] sm:$0xf0] }
  0xd4   :  { %1346 = vmatpush.bf16.msrb.mxu2 %v1930_v3  ;;  %v2164_v3 = vld [vmem:[%s3001_s13 + $0x44] sm:$0xf] }
  0xd8   :  { %1347 = vmatpush.bf16.msrb.mxu2 %v1902_v16  ;;  %v1855_v16 = vld [vmem:[%s3001_s13 + $0x24] sm:$0xf0] }
  0xdc   :  { %1348 = vmatpush.bf16.msrb.mxu2 %v1874_v28  ;;  %v2182_v28 = vld [vmem:[%s3001_s13 + $0xd0] sm:$0xf0] }
 0x14c   :  { %v636_v46 = vpop.f32.mrf.mxu3 }
 0x14d   :  { %v637_v47 = vadd.f32 %v2214_v45, %v636_v46  ;;  %v1994_v45 = vor.u32 %v2195_v40, %v1993_v39  ;;  %v2184_v46 = vld [vmem:[%s3001_s13 + $0xe4] sm:$0xf]  ;;  %v2057_v40 = vld [vmem:[%s3001_s13 + $0x198] sm:$0xf] }
 0x14f   :  { %v640_v48 = vmax.f32 %v637_v47, 0.0  ;;  %v2206_v47 = vld [vmem:[%s3001_s13 + $0x194] sm:$0xf]  ;;  %1370 = vmatpush.bf16.msrb.mxu1 %v1994_v45  ;;  %v2211_v45 = vld [vmem:[%s3001_s13 + $0x1b8] sm:$0xf0] }
 0x150   :  { %v2066_v56 = vor.u32 %v2211_v45, %v2065_v44  ;;  %v1889_v45 = vld [vmem:[%s3001_s13 + $0x48] sm:$0xf] }
 0x151   :  { %v641_v49 = vpack.c.bf16 %v640_v48, %v640_v48  ;;  %v2051_v48 = vld [vmem:[%s3001_s13 + $0x1ac] sm:$0xf0] }
 0x152   :  { %v2054_v52 = vor.u32 %v2206_v47, %v2051_v48  ;;  %v1846_v47 = vor.u32 %v2159_v30, %v1845_v29  ;;  %v2171_v48 = vld [vmem:[%s3001_s13 + $0x7c] sm:$0xf]  ;;  %v1946_v30 = vor.u32 %v2182_v28, %v1945_v27 }
 0x153   :  { %718 = vmatmul.bf16.vlgmr.msra.gmra.mxu2 %v641_v49  ;;  %v1959_v49 = vld [vmem:[%s3001_s13 + $0xfc] sm:$0xf0]  ;;  %v2179_v29 = vld [vmem:[%s3001_s13 + $0xbc] sm:$0xf] }
 0x154   :  { %v638_v50 = vpop.f32.mrf.mxu3  ;;  %1381 = vmatpush.bf16.msrb.mxu3 %v2054_v52  ;;  %v1962_v58 = vor.u32 %v2184_v46, %v1959_v49  ;;  %v1911_v49 = vld [vmem:[%s3001_s13 + $0x94] sm:$0xf0]  ;;  %1349 = vmatpush.bf16.msrb.mxu2 %v1846_v47  ;;  %v2165_v47 = vld [vmem:[%s3001_s13 + $0x4c] sm:$0xf] }
 0x155   :  { %v1965_v50 = vld [vmem:[%s3001_s13 + $0xe8] sm:$0xf] }
 0x156   :  { %1358 = vmatpush.bf16.msrb.mxu0 %v1962_v58  ;;  %v2203_v58 = vld [vmem:[%s3001_s13 + $0x178] sm:$0xf0] }
 0x1d6   :  { %v719_v60 = vpop.f32.mrf.mxu2 }
 0x1d7   :  { %v720_v61 = vadd.f32 %v2215_v59, %v719_v60  ;;  %v1966_v59 = vor.u32 %v2188_v51, %v1965_v50  ;;  %v2177_v60 = vld [vmem:[%s3001_s13 + $0xac] sm:$0xf]  ;;  %v1850_v50 = vor.u32 %v2156_v31, %v1847_v36  ;;  %v1854_v51 = vor.u32 %v2160_v38, %v1853_v37  ;;  %v1947_v31 = vld [vmem:[%s3001_s13 + $0xd4] sm:$0xf0]  ;;  %v1917_v36 = vld [vmem:[%s3001_s13 + $0x80] sm:$0xf] }
 0x1d8   :  { %v2175_v37 = vld [vmem:[%s3001_s13 + $0x98] sm:$0xf0]  ;;  %v2172_v38 = vld [vmem:[%s3001_s13 + $0x84] sm:$0xf] }
 0x1d9   :  { %v723_v62 = vmax.f32 %v720_v61, 0.0  ;;  %v1931_v61 = vld [vmem:[%s3001_s13 + $0xc4] sm:$0xf0]  ;;  %1371 = vmatpush.bf16.msrb.mxu1 %v1966_v59  ;;  %v2200_v59 = vld [vmem:[%s3001_s13 + $0x164] sm:$0xf] }
 0x1da   :  { %v1934_v7 = vor.u32 %v2177_v60, %v1931_v61  ;;  %v2031_v60 = vld [vmem:[%s3001_s13 + $0x17c] sm:$0xf0]  ;;  %v2037_v61 = vld [vmem:[%s3001_s13 + $0x168] sm:$0xf] }
 0x1db   :  { %v724_v63 = vpack.c.bf16 %v723_v62, %v723_v62  ;;  %v1937_v62 = vld [vmem:[%s3001_s13 + $0xb0] sm:$0xf]  ;;  %v2034_v1 = vor.u32 %v2200_v59, %v2031_v60  ;;  %v2162_v59 = vld [vmem:[%s3001_s13 + $0x30] sm:$0xf0] }
 0x1dc   :  { %1359 = vmatpush.bf16.msrb.mxu0 %v1934_v7  ;;  %v2196_v7 = vld [vmem:[%s3001_s13 + $0x140] sm:$0xf0] }
 0x1dd   :  { %801 = vmatmul.bf16.vlgmr.msra.gmra.mxu0 %v724_v63  ;;  %v2026_v63 = vor.u32 %v2199_v53, %v2023_v57  ;;  %v2058_v53 = vor.u32 %v2210_v41, %v2057_v40  ;;  %v1914_v57 = vor.u32 %v2171_v48, %v1911_v49  ;;  %v1919_v40 = vld [vmem:[%s3001_s13 + $0x9c] sm:$0xf0]  ;;  %v1925_v41 = vld [vmem:[%s3001_s13 + $0x88] sm:$0xf]  ;;  %v1897_v49 = vld [vmem:[%s3001_s13 + $0x50] sm:$0xf] }
 0x1de   :  { %v721_v0 = vpop.f32.mrf.mxu2  ;;  %v1922_v43 = vor.u32 %v2172_v38, %v1919_v40  ;;  %v1926_v44 = vor.u32 %v2176_v42, %v1925_v41  ;;  %v1891_v48 = vld [vmem:[%s3001_s13 + $0x64] sm:$0xf0] }
 0x1df   :  { %v2181_v0 = vld [vmem:[%s3001_s13 + $0xc8] sm:$0xf0]  ;;  %1382 = vmatpush.bf16.msrb.mxu3 %v2026_v63  ;;  %1394 = vmatpush.bf16.msra.mxu2 %v2058_v53 }
 0x1e0   :  { %v1938_v8 = vor.u32 %v2181_v0, %v1937_v62  ;;  %v2204_v62 = vld [vmem:[%s3001_s13 + $0x180] sm:$0xf0]  ;;  %v2030_v0 = vor.u32 %v2203_v58, %v2029_v55  ;;  %v2161_v55 = vld [vmem:[%s3001_s13 + $0x28] sm:$0xf0]  ;;  %v1869_v58 = vld [vmem:[%s3001_s13 + $0x18] sm:$0xf] }
 0x1e1   :  { %v2038_v2 = vor.u32 %v2204_v62, %v2037_v61  ;;  %v1870_v62 = vor.u32 %v2162_v59, %v1869_v58 }
 0x1e2   :  { %1372 = vmatpush.bf16.msrb.mxu1 %v1938_v8  ;;  %v2193_v8 = vld [vmem:[%s3001_s13 + $0x12c] sm:$0xf] }
 0x1e3   :  { %1383 = vmatpush.bf16.msrb.mxu3 %v1998_v6  ;;  %1395 = vmatpush.bf16.msra.mxu2 %v2030_v0  ;;  %v1886_v6 = vor.u32 %v2164_v3, %v1883_v4 }
 0x25a   :  { %v802_v10 = vpop.f32.mrf.mxu0 }
 0x25b   :  { %v803_v11 = vadd.f32 %v2216_v9, %v802_v10  ;;  %v2170_v9 = vld [vmem:[%s3001_s13 + $0x74] sm:$0xf]  ;;  %v2185_v10 = vld [vmem:[%s3001_s13 + $0xec] sm:$0xf] }
 0x25d   :  { %v806_v12 = vmax.f32 %v803_v11, 0.0  ;;  %v1967_v11 = vld [vmem:[%s3001_s13 + $0x104] sm:$0xf0] }
 0x25e   :  { %v1970_v19 = vor.u32 %v2185_v10, %v1967_v11  ;;  %v2002_v10 = vor.u32 %v2196_v7, %v2001_v5  ;;  %v1038_v5 = vld [vmem:[%s3002_s14] sm:$0x7f] }
 0x25f   :  { %v807_v13 = vpack.c.bf16 %v806_v12, %v806_v12  ;;  %v1903_v12 = vld [vmem:[%s3001_s13 + $0x8c] sm:$0xf0]  ;;  %v1042_v7 = vperm.slane %v1038_v5, 2  ;;  %v1045_v25 = vperm.slane %v1038_v5, 5  ;;  %v1046_v28 = vperm.slane %v1038_v5, 6 }
 0x260   :  { %v1906_v20 = vor.u32 %v2170_v9, %v1903_v12  ;;  %1384 = vmatpush.bf16.msrb.mxu3 %v1970_v19  ;;  %v2003_v9 = vld [vmem:[%s3001_s13 + $0x144] sm:$0xf0]  ;;  %v2009_v12 = vld [vmem:[%s3001_s13 + $0x130] sm:$0xf]  ;;  %1396 = vmatpush.bf16.msra.mxu2 %v2002_v10  ;;  %v2189_v19 = vld [vmem:[%s3001_s13 + $0x108] sm:$0xf0] }
 0x261   :  { %884 = vmatmul.bf16.vlgmr.msra.gmra.mxu1 %v807_v13  ;;  %v1909_v13 = vld [vmem:[%s3001_s13 + $0x78] sm:$0xf]  ;;  %v2006_v11 = vor.u32 %v2193_v8, %v2003_v9  ;;  %v1974_v22 = vor.u32 %v2189_v19, %v1973_v17  ;;  %v1044_v41 = vperm.slane %v1038_v5, 4 }
 0x262   :  { %v804_v14 = vpop.f32.mrf.mxu0  ;;  %1360 = vmatpush.bf16.msrb.mxu0 %v1906_v20  ;;  %v2186_v20 = vld [vmem:[%s3001_s13 + $0xf4] sm:$0xf] }
 0x263   :  { %v2174_v14 = vld [vmem:[%s3001_s13 + $0x90] sm:$0xf0] }
 0x264   :  { %v1910_v21 = vor.u32 %v2174_v14, %v1909_v13  ;;  %1385 = vmatpush.bf16.msrb.mxu3 %v1942_v32  ;;  %v2197_v13 = vld [vmem:[%s3001_s13 + $0x148] sm:$0xf0]  ;;  %1397 = vmatpush.bf16.msra.mxu2 %v1974_v22  ;;  %v1953_v32 = vld [vmem:[%s3001_s13 + $0xc0] sm:$0xf] }
 0x265   :  { %v2010_v14 = vor.u32 %v2197_v13, %v2009_v12  ;;  %v1040_v13 = vperm.slane %v1038_v5, 0 }
 0x266   :  { %1373 = vmatpush.bf16.msrb.mxu1 %v1910_v21  ;;  %1361 = vmatpush.bf16.msrb.mxu0 %v1878_v34  ;;  %v1975_v21 = vld [vmem:[%s3001_s13 + $0x10c] sm:$0xf0]  ;;  %v1950_v34 = vor.u32 %v2179_v29, %v1947_v31 }
 0x267   :  { %v1978_v23 = vor.u32 %v2186_v20, %v1975_v21 }
 0x268   :  { %1386 = vmatpush.bf16.msrb.mxu3 %v1914_v57  ;;  %1398 = vmatpush.bf16.msra.mxu2 %v1946_v30  ;;  %v1863_v57 = vld [vmem:[%s3001_s13 + $0x2c] sm:$0xf0] }
 0x26a   :  { %1374 = vmatpush.bf16.msrb.mxu1 %v1882_v35  ;;  %1362 = vmatpush.bf16.msrb.mxu0 %v1850_v50  ;;  %v2169_v50 = vld [vmem:[%s3001_s13 + $0x68] sm:$0xf0] }
 0x26b   :  { %v1898_v53 = vor.u32 %v2169_v50, %v1897_v49 }
 0x26c   :  { %1387 = vmatpush.bf16.msrb.mxu3 %v1886_v6  ;;  %v1041_v6 = vperm.slane %v1038_v5, 1 }
 0x26e   :  { %1375 = vmatpush.bf16.msrb.mxu1 %v1854_v51  ;;  %1407 = vmatpush.bf16.msra.mxu0 %v2062_v54  ;;  %v1861_v54 = vld [vmem:[%s3001_s13 + $0x10] sm:$0xf] }
 0x26f   :  { %v1862_v60 = vor.u32 %v2161_v55, %v1861_v54 }
 0x272   :  { %1420 = vmatpush.bf16.msra.mxu1 %v2066_v56  ;;  %1408 = vmatpush.bf16.msra.mxu0 %v2034_v1  ;;  %v2158_v56 = vld [vmem:[%s3001_s13 + $0x14] sm:$0xf] }
 0x273   :  { %v1866_v61 = vor.u32 %v2158_v56, %v1863_v57 }
 0x276   :  { %1421 = vmatpush.bf16.msra.mxu1 %v2038_v2  ;;  %1409 = vmatpush.bf16.msra.mxu0 %v2006_v11 }
 0x27a   :  { %1422 = vmatpush.bf16.msra.mxu1 %v2010_v14  ;;  %1410 = vmatpush.bf16.msra.mxu0 %v1978_v23 }
 0x27e   :  { %1423 = vmatpush.bf16.msra.mxu1 %v1982_v26  ;;  %1411 = vmatpush.bf16.msra.mxu0 %v1950_v34 }
 0x282   :  { %1412 = vmatpush.bf16.msra.mxu0 %v1922_v43 }
 0x2de   :  { %v885_v33 = vpop.f32.mrf.mxu1 }
 0x2df   :  { %v886_v39 = vadd.f32 %v2217_v15, %v885_v33  ;;  %v2157_v15 = vld [vmem:[%s3001_s13 + $0xc] sm:$0xf]  ;;  %v2183_v33 = vld [vmem:[%s3001_s13 + $0xd8] sm:$0xf0] }
 0x2e0   :  { %v1858_v18 = vor.u32 %v2157_v15, %v1855_v16  ;;  %v1954_v35 = vor.u32 %v2183_v33, %v1953_v32  ;;  %v1043_v15 = vperm.slane %v1038_v5, 3 }
 0x2e1   :  { %v889_v46 = vmax.f32 %v886_v39, 0.0  ;;  %v1918_v39 = vor.u32 %v2175_v37, %v1917_v36 }
 0x2e2   :  { %1388 = vmatpush.bf16.msrb.mxu3 %v1858_v18  ;;  %1424 = vmatpush.bf16.msra.mxu1 %v1954_v35 }
 0x2e3   :  { %v890_v52 = vpack.c.bf16 %v889_v46, %v889_v46  ;;  %v2168_v46 = vld [vmem:[%s3001_s13 + $0x60] sm:$0xf0]  ;;  %1399 = vmatpush.bf16.msra.mxu2 %v1918_v39 }
 0x2e4   :  { %v1890_v51 = vor.u32 %v2168_v46, %v1889_v45 }
 0x2e5   :  { %967 = vmatmul.bf16.vlgmr.msra.gmra.mxu3 %v890_v52  ;;  %v1894_v52 = vor.u32 %v2165_v47, %v1891_v48 }
 0x2e6   :  { %v887_v63 = vpop.f32.mrf.mxu1  ;;  %1425 = vmatpush.bf16.msra.mxu1 %v1926_v44 }
 0x2e7   :  { %1400 = vmatpush.bf16.msra.mxu2 %v1890_v51  ;;  %1413 = vmatpush.bf16.msra.mxu0 %v1894_v52  ;;  %v2218_v63 = vld [vmem:[%s3000_s12] ss:$0 sm:$0xff]  ;;  %s2259_s12 = smov [#allocation2]  }
 0x2e8   :  { %s1475_s14 = sshll.u32 %s2259_s12, 4  ;;  %s1476_s14 = int_to_ptr.vmem [resolvable:$true] %s1475_s14 }
 0x2ea   :  { %1426 = vmatpush.bf16.msra.mxu1 %v1898_v53 }
 0x2eb   :  { %1401 = vmatpush.bf16.msra.mxu2 %v1862_v60  ;;  %1414 = vmatpush.bf16.msra.mxu0 %v1866_v61 }
 0x2ee   :  { %1427 = vmatpush.bf16.msra.mxu1 %v1870_v62 }
 0x368   :  { %v968_v0 = vpop.f32.mrf.mxu3 }
 0x369   :  { %v969_v1 = vadd.f32 %v2218_v63, %v968_v0 }
 0x36b   :  { %v972_v2 = vmax.f32 %v969_v1, 0.0 }
 0x36d   :  { %v973_v3 = vpack.c.bf16 %v972_v2, %v972_v2 }
 0x36f   :  { %1350 = vmatmul.bf16.vlgmr.msrb.gmra.mxu2 %v973_v3  ;;  %1363 = vmatmul.bf16.vlgmr.msrb.gmra.mxu0 %v973_v3 }
 0x370   :  { %1376 = vmatmul.bf16.vlgmr.msrb.gmra.mxu1 %v973_v3  ;;  %1389 = vmatmul.bf16.vlgmr.msrb.gmra.mxu3 %v973_v3  ;;  %v970_v4 = vpop.f32.mrf.mxu3 }
 0x37f   :  { %1402 = vmatmul.bf16.vlgmr.msra.gmra.mxu2 %v973_v3  ;;  %1415 = vmatmul.bf16.vlgmr.msra.gmra.mxu0 %v973_v3 }
 0x380   :  { %1428 = vmatmul.bf16.vlgmr.msra.gmra.mxu1 %v973_v3 }
 0x3ec   :  { %v1364_v8 = vpop.f32.mrf.mxu0 }
 0x3ed   :  { %v1365_v9 = vadd.f32 %v1364_v8, %v1041_v6  ;;  %v1377_v10 = vpop.f32.mrf.mxu1 }
 0x3ee   :  { %v1378_v11 = vadd.f32 %v1377_v10, %v1042_v7 }
 0x3ef   :  { %v1434_v12 = vmul.f32 0.5, %v1365_v9 }
 0x3f0   :  { %v1435_v14 = vmul.f32 0.5, %v1378_v11 }
 0x3f1   :  { %2219 = vtanh.f32 %v1434_v12 }
 0x3f2   :  { %v1351_v16 = vpop.f32.mrf.mxu2  ;;  %2221 = vtanh.f32 %v1435_v14 }
 0x3f3   :  { %v1352_v17 = vadd.f32 %v1351_v16, %v1040_v13  ;;  %v1390_v18 = vpop.f32.mrf.mxu3 }
 0x3f4   :  { %v1391_v19 = vadd.f32 %v1390_v18, %v1043_v15  ;;  %v1366_v20 = vpop.f32.mrf.mxu0 }
 0x3f5   :  { %v1433_v21 = vmul.f32 0.5, %v1352_v17  ;;  %v1379_v22 = vpop.f32.mrf.mxu1 }
 0x3f6   :  { %v1436_v23 = vmul.f32 0.5, %v1391_v19 }
 0x3f7   :  { %2223 = vtanh.f32 %v1433_v21  ;;  %v2220_v24 = vpop.eup %2219 }
 0x3f8   :  { %2225 = vtanh.f32 %v1436_v23  ;;  %v2222_v26 = vpop.eup %2221  ;;  %v1448_v30 = vadd.f32 1.0, %v2220_v24 }
 0x3f9   :  { %v1449_v33 = vadd.f32 1.0, %v2222_v26 }
 0x3fa   :  { %v1353_v27 = vpop.f32.mrf.mxu2  ;;  %v1455_v42 = vmul.f32 0.5, %v1448_v30 }
 0x3fb   :  { %v1392_v29 = vpop.f32.mrf.mxu3  ;;  %v1456_v45 = vmul.f32 0.5, %v1449_v33 }
 0x3fc   :  { %v1416_v31 = vpop.f32.mrf.mxu0 }
 0x3fd   :  { %v2224_v32 = vpop.eup %2223  ;;  %v1417_v34 = vadd.f32 %v1416_v31, %v1045_v25  ;;  %v1429_v35 = vpop.f32.mrf.mxu1 }
 0x3fe   :  { %v2226_v36 = vpop.eup %2225  ;;  %v1447_v37 = vadd.f32 1.0, %v2224_v32  ;;  %v1430_v38 = vadd.f32 %v1429_v35, %v1046_v28 }
 0x3ff   :  { %v1450_v39 = vadd.f32 1.0, %v2226_v36  ;;  %v1438_v40 = vmul.f32 0.5, %v1417_v34 }
 0x400   :  { %v1454_v43 = vmul.f32 0.5, %v1447_v37  ;;  %v1439_v44 = vmul.f32 0.5, %v1430_v38 }
 0x401   :  { %v1457_v46 = vmul.f32 0.5, %v1450_v39 }
 0x402   :  { %v1461_v47 = vpack.c.bf16 %v1455_v42, %v1454_v43  ;;  %2227 = vtanh.f32 %v1439_v44  ;;  %v1403_v48 = vpop.f32.mrf.mxu2 }
 0x403   :  { %v1462_v49 = vpack.c.bf16 %v1457_v46, %v1456_v45  ;;  %2229 = vtanh.f32 %v1438_v40  ;;  %v1404_v50 = vadd.f32 %v1403_v48, %v1044_v41 }
 0x404   :  { %1465 = vst [vmem:[#allocation2] sm:$0xff] %v1461_v47  ;;  %v1418_v51 = vpop.f32.mrf.mxu0 }
 0x405   :  { %1466 = vst [vmem:[#allocation2 + $0x8] sm:$0xff] %v1462_v49  ;;  %v1437_v52 = vmul.f32 0.5, %v1404_v50  ;;  %v1431_v53 = vpop.f32.mrf.mxu1 }
 0x407   :  { %2231 = vtanh.f32 %v1437_v52 }
 0x408   :  { %v2228_v54 = vpop.eup %2227 }
 0x409   :  { %v2230_v55 = vpop.eup %2229  ;;  %v1453_v56 = vadd.f32 1.0, %v2228_v54 }
 0x40a   :  { %v1405_v57 = vpop.f32.mrf.mxu2  ;;  %v1452_v59 = vadd.f32 1.0, %v2230_v55 }
 0x40b   :  { %v1460_v58 = vmul.f32 0.5, %v1453_v56 }
 0x40c   :  { %v1459_v63 = vmul.f32 0.5, %v1452_v59 }
 0x40d   :  { %v2232_v60 = vpop.eup %2231  ;;  %v1464_v61 = vpack.c.bf16 %v1460_v58, %v1460_v58 }
 0x40e   :  { %v1451_v62 = vadd.f32 1.0, %v2232_v60 }
 0x40f   :  { %1469 = vst.msk [vmem:[#allocation2 + $0x18] sm:$0xf] %vm1468_vm1, %v1464_v61 }
 0x410   :  { %v1458_v0 = vmul.f32 0.5, %v1451_v62 }
 0x412   :  { %v1463_v1 = vpack.c.bf16 %v1459_v63, %v1458_v0 }
 0x414   :  { %1467 = vst [vmem:[#allocation2 + $0x10] sm:$0xff] %v1463_v1 }
 0x415   :  { %1480 = dma.vmem_to_hbm [thread:$0]  %s1476_s14, 448, %s1478_s10, [#allocation3]  }
 0x416   :  { %2257 = dma.done.wait [#allocation3], 448  }
 0x417   :  { %2258 = vsyncadd [#allocation3], 4294966848 }
 0x418   :  { %1485 = vsyncpa [#allocation3], 1 }

</bundles_post_ra>
